<compile_context>
chip_gen: v6e
topology: v6e:2x2x1
jax: 0.10.0
libtpu: 0.0.40
codegen_flags: <defaults>
</compile_context>

<pallas_src>
import math

import jax
import jax.numpy as jnp
import numpy as np
from jax.experimental import pallas as pl
from jax.experimental.pallas import tpu as pltpu


def _disc_score_kernel(act_ref, obs_ref, w_act_ref, w_obs_ref, bias_ref, score_ref):
    # act_ref: (S*A, TB), obs_ref: (S_obs*D, TB)      -- batch on the 128-lane axis
    # w_act:   (2N, S*A), w_obs: (2N, S_obs*D), bias: (2N, 1)
    n = w_act_ref.shape[0] // 2          # N = S + S_obs kv tokens

    # Each folded weight is zero on the other stream's token rows, so a VPU add replaces
    # any concat (concats/reshapes materialize VMEM copies in Mosaic).
    lv = (jnp.dot(w_act_ref[...], act_ref[...], preferred_element_type=jnp.float32)
          + jnp.dot(w_obs_ref[...], obs_ref[...], preferred_element_type=jnp.float32)
          + bias_ref[...])                                            # (2N, TB)

    logits = lv[:n, :]   # (N, TB) attention logits (wq/wk/pos and 1/sqrt(E) folded in)
    vals = lv[n:, :]     # (N, TB) per-token score contributions (wv@wo@ws.T + score bias folded)

    # TODO(synk): decoder is hydra-instantiated (config not provided); this softmax-weighted
    # average over the N kv tokens is the stand-in single-head CLS attention read-out.
    m = jnp.max(logits, axis=0, keepdims=True)                        # (1, TB) sublane reduce
    p = jnp.exp(logits - m)                                           # EUP
    denom = jnp.sum(p, axis=0, keepdims=True)                         # (1, TB)
    num = jnp.sum(p * vals, axis=0, keepdims=True)                    # (1, TB)
    # score-head bias is already folded onto `vals`; divide goes to the EUP reciprocal.
    score_ref[...] = jax.nn.sigmoid(num * pl.reciprocal(denom, approx=True))


def _fold_params(p, seq_size, obs_seq):
    """Fold cls/wq/wk/wv/wo/ws/pos/ba and the action/obs embeddings into block-diagonal
    per-token logit/value projections.  Depends only on params (amortized across calls)."""
    f32 = jnp.float32
    action_dim = p["wa"].shape[0]
    obs_dim = p["wm"].shape[0]
    e = p["wa"].shape[1]
    n = seq_size + obs_seq

    q_cls = p["cls"] @ p["wq"]                                 # (1, E)  batch-independent query
    kq = (p["wk"] @ q_cls.T) * (1.0 / math.sqrt(e))            # (E, 1)  token -> logit
    v_os = p["wv"] @ (p["wo"] @ p["ws"].T)                     # (E, 1)  token -> score value
    sb = (p["cls"] @ p["ws"].T + p["bsc"])[0, 0]               # scalar  residual + score bias

    a_l = (p["wa"] @ kq)[:, 0]                                 # (A,)
    a_v = (p["wa"] @ v_os)[:, 0]                               # (A,)
    m_l = (p["wm"] @ kq)[:, 0]                                 # (D_obs,)
    m_v = (p["wm"] @ v_os)[:, 0]                               # (D_obs,)

    pos_b = p["ba"] + p["pos"][:seq_size]                      # (S, E)   only the used S rows
    pos_l = (pos_b @ kq)[:, 0]                                 # (S,)
    pos_v = (pos_b @ v_os)[:, 0]                               # (S,)

    def bd(vec, t):                                            # (t, t*K) block-diagonal
        return jnp.kron(jnp.eye(t, dtype=f32), vec[None, :].astype(f32))

    # TODO(synk): action_encoder is hydra-instantiated (config not provided); identity here,
    # which is what makes this linear folding exact.
    w_act = jnp.zeros((2 * n, seq_size * action_dim), f32)
    w_act = w_act.at[0:seq_size].set(bd(a_l, seq_size))
    w_act = w_act.at[n:n + seq_size].set(bd(a_v, seq_size))

    w_obs = jnp.zeros((2 * n, obs_seq * obs_dim), f32)
    w_obs = w_obs.at[seq_size:n].set(bd(m_l, obs_seq))
    w_obs = w_obs.at[n + seq_size:2 * n].set(bd(m_v, obs_seq))

    # rows 0..N-1: logit bias (pos/ba for action tokens, 0 for obs tokens)
    # rows N..2N-1: value bias (pos/ba for action tokens) + score bias sb on EVERY value row
    #               (a constant shift commutes with the softmax-weighted average).
    bias = jnp.zeros((2 * n, 1), f32)
    bias = bias.at[0:seq_size, 0].set(pos_l)
    bias = bias.at[n:n + seq_size, 0].set(pos_v)
    bias = bias + jnp.concatenate(
        [jnp.zeros((n, 1), f32), jnp.full((n, 1), sb, f32)], axis=0)
    return w_act, w_obs, bias


def _two_tensorcore_chip():
    # Only v7x (2 TensorCores/chip) benefits from >=2 grid steps; on v5e/v6e the grid is a
    # serial loop and a single step is best.
    try:
        return "v7" in jax.devices()[0].device_kind.lower()
    except Exception:
        return False


def discriminator_forward(action, obs, params, *, batch_tile=None):
    bs, seq_size, action_dim = action.shape
    _, obs_seq, obs_dim = obs.shape

    w_act, w_obs, bias = _fold_params(params, seq_size, obs_seq)

    # Lane-dense, pre-transposed activations: batch on the 128-lane axis everywhere.
    act_t = action.reshape(bs, seq_size * action_dim).T        # (S*A, B)
    obs_t = obs.reshape(bs, obs_seq * obs_dim).T               # (S_obs*D_obs, B)

    if batch_tile is None:
        if _two_tensorcore_chip() and bs >= 256 and bs % 256 == 0:
            batch_tile = bs // 2        # two 128-multiple lane tiles -> both v7x TensorCores
        else:
            batch_tile = bs             # single grid step (best on single-TC v5e/v6e)
    assert bs % batch_tile == 0, "batch size must be a multiple of the batch tile"
    assert batch_tile == bs or batch_tile % 128 == 0, \
        "lane-axis (batch) tiles must be the full batch or a multiple of 128"
    num_tiles = bs // batch_tile

    def full_spec(arr):
        return pl.BlockSpec(arr.shape, lambda b: (0, 0))

    score_row = pl.pallas_call(
        _disc_score_kernel,
        out_shape=jax.ShapeDtypeStruct((1, bs), jnp.float32),
        grid_spec=pltpu.PrefetchScalarGridSpec(
            num_scalar_prefetch=0,
            grid=(num_tiles,),
            in_specs=[
                pl.BlockSpec((seq_size * action_dim, batch_tile), lambda b: (0, b)),
                pl.BlockSpec((obs_seq * obs_dim, batch_tile), lambda b: (0, b)),
                full_spec(w_act),
                full_spec(w_obs),
                full_spec(bias),
            ],
            out_specs=pl.BlockSpec((1, batch_tile), lambda b: (0, b)),
        ),
        # Per-step output block => batch tiles are independent => safe to mark parallel
        # (shards grid steps across TensorCores on v7x; no-op on v5e/v6e).
        compiler_params=pltpu.CompilerParams(dimension_semantics=("parallel",)),
    )(act_t, obs_t, w_act, w_obs, bias)

    return score_row.reshape(bs, 1)     # torch-shaped (B, 1) score


def discriminator_ref(action, obs, p):
    """Pure-JAX reference of the same forward (same stand-in decoder), UNFOLDED."""
    bs, seq_size, _ = action.shape
    e = p["wa"].shape[-1]
    x = action @ p["wa"] + p["ba"] + p["pos"][None, :seq_size, :]
    mem = obs @ p["wm"]
    kv = jnp.concatenate([x, mem], axis=1)                       # (B, S+S_obs, E)
    k = kv @ p["wk"]
    v = kv @ p["wv"]
    q_cls = p["cls"] @ p["wq"]                                   # (1, E)
    logits = jnp.einsum("bne,qe->bqn", k, q_cls) / math.sqrt(e)  # (B, 1, N)
    probs = jax.nn.softmax(logits, axis=-1)
    attn = jnp.einsum("bqn,bne->bqe", probs, v)[:, 0, :]         # (B, E)
    out_cls = p["cls"] + attn @ p["wo"]
    return jax.nn.sigmoid(out_cls @ p["ws"].T + p["bsc"])        # (B, 1)


def make_params(key, action_dim, obs_dim, seq_size, embed_dim):
    # Matches nn.Linear init of the torch module (_init_weights): W ~ N(0, 0.02), b = 0.
    # torch inits pos_emb / cls_emb to zeros; small normals here so those paths are exercised.
    ks = jax.random.split(key, 9)
    std = 0.02
    f32 = jnp.float32

    def n(k, shape):
        return (jax.random.normal(k, shape) * std).astype(f32)

    return {
        "wa":  n(ks[0], (action_dim, embed_dim)),
        "ba":  jnp.zeros((1, embed_dim), f32),
        "pos": n(ks[1], (seq_size + 1, embed_dim)),
        "cls": n(ks[2], (1, embed_dim)),
        "wm":  n(ks[3], (obs_dim, embed_dim)),        # obs -> E memory projection (decoder stand-in)
        "wq":  n(ks[4], (embed_dim, embed_dim)),
        "wk":  n(ks[5], (embed_dim, embed_dim)),
        "wv":  n(ks[6], (embed_dim, embed_dim)),
        "wo":  n(ks[7], (embed_dim, embed_dim)),
        "ws":  n(ks[8], (1, embed_dim)),              # torch Linear(E, 1).weight layout: (1, E)
        "bsc": jnp.zeros((1, 1), f32),
    }


if __name__ == "__main__":
    bs, seq_size, action_dim = 2, 8, 4
    obs_seq, obs_dim = 8, 16
    embed_dim = 32

    key = jax.random.PRNGKey(0)
    k_act, k_obs, k_par = jax.random.split(key, 3)

    action = jax.random.normal(k_act, (bs, seq_size, action_dim), jnp.float32)
    obs = jax.random.normal(k_obs, (bs, obs_seq, obs_dim), jnp.float32)
    params = make_params(k_par, action_dim, obs_dim, seq_size, embed_dim)

    score = jax.block_until_ready(discriminator_forward(action, obs, params))

    ref = discriminator_ref(action, obs, params)
    # Folded algebra + approx reciprocal change the f32 rounding order slightly.
    np.testing.assert_allclose(np.asarray(score), np.asarray(ref), rtol=1e-4, atol=1e-4)
    assert score.shape == (bs, 1)

    print("KERNEL_OK")
</pallas_src>

<mosaic_0001>
module attributes {stable_mosaic.version = 11 : i64} {
  func.func @_disc_score_kernel(%arg0: i32, %arg1: memref<32x2xf32, #tpu.memory_space<vmem>>, %arg2: memref<128x2xf32, #tpu.memory_space<vmem>>, %arg3: memref<32x32xf32, #tpu.memory_space<vmem>>, %arg4: memref<32x128xf32, #tpu.memory_space<vmem>>, %arg5: memref<32x1xf32, #tpu.memory_space<vmem>>, %arg6: memref<1x2xf32, #tpu.memory_space<vmem>>) attributes {dimension_semantics = [#tpu.dimension_semantics<parallel>], iteration_bounds = array<i64: 1>, scalar_prefetch = 0 : i64, scratch_operands = 0 : i64, tpu.core_type = #tpu.core_type<tc>, window_params = [{transform_indices = @transform_0, window_bounds = array<i64: 32, 2>}, {transform_indices = @transform_1, window_bounds = array<i64: 128, 2>}, {pipeline_mode = #tpu.pipeline_mode<synchronous>, transform_indices = @transform_2, window_bounds = array<i64: 32, 32>}, {pipeline_mode = #tpu.pipeline_mode<synchronous>, transform_indices = @transform_3, window_bounds = array<i64: 32, 128>}, {pipeline_mode = #tpu.pipeline_mode<synchronous>, transform_indices = @transform_4, window_bounds = array<i64: 32, 1>}, {transform_indices = @transform_5, window_bounds = array<i64: 1, 2>}]} {
    %c0 = arith.constant 0 : index
    %c0_0 = arith.constant 0 : index
    %0 = vector.load %arg3[%c0, %c0_0] : memref<32x32xf32, #tpu.memory_space<vmem>>, vector<32x32xf32>
    %c0_1 = arith.constant 0 : index
    %c0_2 = arith.constant 0 : index
    %1 = vector.load %arg1[%c0_1, %c0_2] : memref<32x2xf32, #tpu.memory_space<vmem>>, vector<32x2xf32>
    %cst = arith.constant dense<0.000000e+00> : vector<32x2xf32>
    %2 = tpu.matmul %0, %1, %cst {dimension_numbers = #tpu.dot_dimension_numbers<[1], [0], [0], [1], [0, 0, 1, 1], [], []>} : vector<32x32xf32>, vector<32x2xf32>, vector<32x2xf32> -> vector<32x2xf32>
    %c0_3 = arith.constant 0 : index
    %c0_4 = arith.constant 0 : index
    %3 = vector.load %arg4[%c0_3, %c0_4] : memref<32x128xf32, #tpu.memory_space<vmem>>, vector<32x128xf32>
    %c0_5 = arith.constant 0 : index
    %c0_6 = arith.constant 0 : index
    %4 = vector.load %arg2[%c0_5, %c0_6] : memref<128x2xf32, #tpu.memory_space<vmem>>, vector<128x2xf32>
    %cst_7 = arith.constant dense<0.000000e+00> : vector<32x2xf32>
    %5 = tpu.matmul %3, %4, %cst_7 {dimension_numbers = #tpu.dot_dimension_numbers<[1], [0], [0], [1], [0, 0, 1, 1], [], []>} : vector<32x128xf32>, vector<128x2xf32>, vector<32x2xf32> -> vector<32x2xf32>
    %6 = arith.addf %2, %5 : vector<32x2xf32>
    %c0_8 = arith.constant 0 : index
    %c0_9 = arith.constant 0 : index
    %7 = vector.load %arg5[%c0_8, %c0_9] : memref<32x1xf32, #tpu.memory_space<vmem>>, vector<32x1xf32>
    %8 = vector.broadcast %7 : vector<32x1xf32> to vector<32x2xf32>
    %9 = arith.addf %6, %8 : vector<32x2xf32>
    %10 = vector.extract_strided_slice %9 {offsets = [0, 0], sizes = [16, 2], strides = [1, 1]} : vector<32x2xf32> to vector<16x2xf32>
    %11 = vector.extract_strided_slice %9 {offsets = [16, 0], sizes = [16, 2], strides = [1, 1]} : vector<32x2xf32> to vector<16x2xf32>
    %cst_10 = arith.constant dense<0xFF800000> : vector<2xf32>
    %12 = vector.multi_reduction <maximumf>, %10, %cst_10 [0] : vector<16x2xf32> to vector<2xf32>
    %13 = vector.shape_cast %12 : vector<2xf32> to vector<1x2xf32>
    %14 = vector.broadcast %13 : vector<1x2xf32> to vector<16x2xf32>
    %15 = arith.subf %10, %14 : vector<16x2xf32>
    %16 = math.exp %15 : vector<16x2xf32>
    %cst_11 = arith.constant dense<0.000000e+00> : vector<2xf32>
    %17 = vector.multi_reduction <add>, %16, %cst_11 [0] : vector<16x2xf32> to vector<2xf32>
    %18 = vector.shape_cast %17 : vector<2xf32> to vector<1x2xf32>
    %19 = arith.mulf %16, %11 : vector<16x2xf32>
    %cst_12 = arith.constant dense<0.000000e+00> : vector<2xf32>
    %20 = vector.multi_reduction <add>, %19, %cst_12 [0] : vector<16x2xf32> to vector<2xf32>
    %21 = vector.shape_cast %20 : vector<2xf32> to vector<1x2xf32>
    %22 = tpu.reciprocal %18 {approx = true} : vector<1x2xf32> -> vector<1x2xf32>
    %23 = arith.mulf %21, %22 : vector<1x2xf32>
    %24 = arith.negf %23 : vector<1x2xf32>
    %25 = math.exp %24 : vector<1x2xf32>
    %cst_13 = arith.constant 1.000000e+00 : f32
    %26 = vector.broadcast %cst_13 : f32 to vector<1x2xf32>
    %27 = arith.addf %26, %25 : vector<1x2xf32>
    %28 = arith.divf %26, %27 : vector<1x2xf32>
    %c0_14 = arith.constant 0 : index
    %c0_15 = arith.constant 0 : index
    %29 = vector.load %arg6[%c0_14, %c0_15] : memref<1x2xf32, #tpu.memory_space<vmem>>, vector<1x2xf32>
    tpu.vector_store %arg6[%c0_14, %c0_15], %28 {strides = array<i32>} : memref<1x2xf32, #tpu.memory_space<vmem>>, vector<1x2xf32>,
    return
  }
  func.func @transform_0(%arg0: i32) -> (i32, i32) {
    %c0_i32 = arith.constant 0 : i32
    %c0_i32_0 = arith.constant 0 : i32
    return %c0_i32, %arg0 : i32, i32
  }
  func.func @transform_1(%arg0: i32) -> (i32, i32) {
    %c0_i32 = arith.constant 0 : i32
    %c0_i32_0 = arith.constant 0 : i32
    return %c0_i32, %arg0 : i32, i32
  }
  func.func @transform_2(%arg0: i32) -> (i32, i32) {
    %c0_i32 = arith.constant 0 : i32
    %c0_i32_0 = arith.constant 0 : i32
    %c0_i32_1 = arith.constant 0 : i32
    return %c0_i32, %c0_i32_0 : i32, i32
  }
  func.func @transform_3(%arg0: i32) -> (i32, i32) {
    %c0_i32 = arith.constant 0 : i32
    %c0_i32_0 = arith.constant 0 : i32
    %c0_i32_1 = arith.constant 0 : i32
    return %c0_i32, %c0_i32_0 : i32, i32
  }
  func.func @transform_4(%arg0: i32) -> (i32, i32) {
    %c0_i32 = arith.constant 0 : i32
    %c0_i32_0 = arith.constant 0 : i32
    %c0_i32_1 = arith.constant 0 : i32
    return %c0_i32, %c0_i32_0 : i32, i32
  }
  func.func @transform_5(%arg0: i32) -> (i32, i32) {
    %c0_i32 = arith.constant 0 : i32
    %c0_i32_0 = arith.constant 0 : i32
    return %c0_i32, %arg0 : i32, i32
  }
}

</mosaic_0001>

<bundles_post_ra>
// kernel: tpu_custom_call.1
= control target key start
LH: loop header
LB: loop body
LE: loop exit
PB: predicated region body
PF: predicated region fallthrough
CT: control target
= control target key end

     0   :  { %v441_v2 = vmov 0   ;;  %vm134_vm0 = vcmask 261120   ;;  %s582_s0 = inlined_call_operand.vmem [shape: f32[32,2], index: 0, kind: input, shape index: {}]   ;;  %s583_s1 = inlined_call_operand.vmem [shape: f32[128,2], index: 1, kind: input, shape index: {}]   ;;  %s584_s2 = inlined_call_operand.vmem [shape: f32[32,32], index: 2, kind: input, shape index: {}]   ;;  %s585_s3 = inlined_call_operand.vmem [shape: f32[32,128], index: 3, kind: input, shape index: {}]   ;;  %s586_s4 = inlined_call_operand.vmem [shape: f32[32,1], index: 4, kind: input, shape index: {}]   ;;  %s587_s5 = inlined_call_operand.hbm [shape: f32[1,2], index: 5, kind: output, shape index: {}]  }
   0x1   :  { %v48_v0 = vld [vmem:[%s583_s1 + $0x78] sm:$0xff]  ;;  %v47_v1 = vld [vmem:[%s583_s1 + $0x70] sm:$0xff]  ;;  %407 = vset.pattern.permute.xlu0 %v441_v2  ;;  %v46_v3 = vld [vmem:[%s583_s1 + $0x68] sm:$0xff]  ;;  %408 = vset.pattern.permute.xlu1 %v441_v2 }
   0x2   :  { %353 = vmatprep.subr.mxu0 %v48_v0  ;;  %v45_v4 = vld [vmem:[%s583_s1 + $0x60] sm:$0xff]  ;;  %v28_v5 = vld [vmem:[%s582_s0 + $0x18] sm:$0xff]  ;;  %v27_v6 = vld [vmem:[%s582_s0 + $0x10] sm:$0xff] }
   0x3   :  { %354 = vmatpush3.msra.mxu0 %v48_v0  ;;  %391 = vmatprep.subr.mxu1 %v28_v5  ;;  %v44_v7 = vld [vmem:[%s583_s1 + $0x58] sm:$0xff]  ;;  %v26_v8 = vld [vmem:[%s582_s0 + $0x8] sm:$0xff]  ;;  %v43_v9 = vld [vmem:[%s583_s1 + $0x50] sm:$0xff] }
   0x4   :  { %355 = vmatprep.subr.mxu0 %v47_v1  ;;  %392 = vmatpush3.msra.mxu1 %v28_v5  ;;  %v25_v10 = vld [vmem:[%s582_s0] sm:$0xff]  ;;  %v42_v11 = vld [vmem:[%s583_s1 + $0x48] sm:$0xff] }
   0x5   :  { %356 = vmatpush3.msra.mxu0 %v47_v1  ;;  %393 = vmatprep.subr.mxu1 %v27_v6  ;;  %v21_v12 = vld [vmem:[%s584_s2] sm:$0xff] }
   0x6   :  { %357 = vmatprep.subr.mxu0 %v46_v3  ;;  %394 = vmatpush3.msra.mxu1 %v27_v6 }
   0x7   :  { %358 = vmatpush3.msra.mxu0 %v46_v3  ;;  %395 = vmatprep.subr.mxu1 %v26_v8 }
   0x8   :  { %359 = vmatprep.subr.mxu0 %v45_v4  ;;  %396 = vmatpush3.msra.mxu1 %v26_v8 }
   0x9   :  { %360 = vmatpush3.msra.mxu0 %v45_v4 }
   0xa   :  { %361 = vmatprep.subr.mxu0 %v44_v7 }
   0xb   :  { %362 = vmatpush3.msra.mxu0 %v44_v7 }
   0xc   :  { %10 = vsyncpa [#allocation3], 0  ;;  %363 = vmatprep.subr.mxu0 %v43_v9  ;;  %397 = vmatprep.subr.mxu1 %v25_v10  ;;  %v22_v13 = vld [vmem:[%s584_s2 + $0x8] sm:$0xff]  ;;  %v41_v14 = vld [vmem:[%s583_s1 + $0x40] sm:$0xff]  ;;  %vm260_vm1 = vcmask 15360   ;;  %vm304_vm2 = vcmask 8192  }
   0xd   :  { %364 = vmatpush3.msra.mxu0 %v43_v9  ;;  %398 = vmatpush3.msra.mxu1 %v25_v10  ;;  %v29_v15 = vld [vmem:[%s585_s3] sm:$0xff]  ;;  %v23_v16 = vld [vmem:[%s584_s2 + $0x10] sm:$0xff]  ;;  %v40_v17 = vld [vmem:[%s583_s1 + $0x38] sm:$0xff] }
   0xe   :  { %365 = vmatprep.subr.mxu0 %v42_v11  ;;  %399 = vmatprep.mubr.msk.f32.mxu1 %vm134_vm0, %v21_v12  ;;  %v232_v18 = vld [vmem:[%s586_s4] sm:$0xff]  ;;  %v24_v19 = vld [vmem:[%s584_s2 + $0x18] sm:$0xff]  ;;  %v39_v20 = vld [vmem:[%s583_s1 + $0x30] sm:$0xff] }
   0xf   :  { %366 = vmatpush3.msra.mxu0 %v42_v11  ;;  %400 = vmatmul.mubr.msk.f32.vlgmr.msra.gmra.mxu1 %vm134_vm0, %v22_v13  ;;  %v234_v21 = vld [vmem:[%s586_s4 + $0x10] sm:$0xff]  ;;  %v38_v22 = vld [vmem:[%s583_s1 + $0x28] sm:$0xff]  ;;  %v37_v24 = vld [vmem:[%s583_s1 + $0x20] sm:$0xff] }
  0x10   :  { %367 = vmatprep.subr.mxu0 %v41_v14  ;;  %385 = vmatprep.mubr.f32.mxu0 %v29_v15  ;;  %v233_v23 = vld [vmem:[%s586_s4 + $0x8] sm:$0xff]  ;;  %v235_v25 = vld [vmem:[%s586_s4 + $0x18] sm:$0xff]  ;;  %v35_v27 = vld [vmem:[%s583_s1 + $0x10] sm:$0xff] }
  0x11   :  { %368 = vmatpush3.msra.mxu0 %v41_v14  ;;  %402 = vmatprep.mubr.msk.f32.mxu1 %vm134_vm0, %v23_v16  ;;  %v36_v26 = vld [vmem:[%s583_s1 + $0x18] sm:$0xff]  ;;  %v34_v28 = vld [vmem:[%s583_s1 + $0x8] sm:$0xff]  ;;  %v33_v29 = vld [vmem:[%s583_s1] sm:$0xff]  ;;  %s442_s1 = smov [#allocation2]  }
  0x12   :  { %369 = vmatprep.subr.mxu0 %v40_v17  ;;  %238 = vperm.xlu0 %407, %v232_v18   ;;  %v30_v30 = vld [vmem:[%s585_s3 + $0x8] sm:$0xff]  ;;  %v31_v31 = vld [vmem:[%s585_s3 + $0x10] sm:$0xff]  ;;  %v32_v32 = vld [vmem:[%s585_s3 + $0x18] sm:$0xff]  ;;  %s312_s3 = sshll.u32 %s442_s1, 4  ;;  %s313_s3 = int_to_ptr.vmem [resolvable:$true] %s312_s3 }
  0x13   :  { %370 = vmatpush3.msra.mxu0 %v40_v17  ;;  %403 = vmatmul.mubr.msk.f32.gmra.mxu1 %vm134_vm0, %v24_v19  ;;  %s419_s28 = scalar_lea.vmem %s313_s3, 16  ;;  %s423_s29 = scalar_lea.vmem %s313_s3, 32 }
  0x14   :  { %371 = vmatprep.subr.mxu0 %v39_v20  ;;  %248 = vperm.xlu1 %408, %v234_v21   ;;  %p420_p0 = scmp.ne.s32.totalorder %s313_s3, %s419_s28  ;;  %p424_p1 = scmp.lt.s32.totalorder %s313_s3, %s313_s3 }
  0x15   :  { %372 = vmatpush3.msra.mxu0 %v39_v20  ;;  %p425_p2 = scmp.lt.s32.totalorder %s423_s29, %s419_s28 }
  0x16   :  { %373 = vmatprep.subr.mxu0 %v38_v22  ;;  %243 = vperm.xlu0 %407, %v233_v23  }
  0x17   :  { %374 = vmatpush3.msra.mxu0 %v38_v22  ;;  %p426_p3 = por %p425_p2, %p424_p1 }
  0x18   :  { %375 = vmatprep.subr.mxu0 %v37_v24  ;;  %253 = vperm.xlu1 %408, %v235_v25  }
  0x19   :  { %376 = vmatpush3.msra.mxu0 %v37_v24  ;;  %p427_p4 = pnand %p426_p3, %p420_p0 }
  0x1a   :  { %377 = vmatprep.subr.mxu0 %v36_v26 }
  0x1b   :  { %378 = vmatpush3.msra.mxu0 %v36_v26 }
  0x1c   :  { %379 = vmatprep.subr.mxu0 %v35_v27 }
  0x1d   :  { %380 = vmatpush3.msra.mxu0 %v35_v27 }
  0x1e   :  { %381 = vmatprep.subr.mxu0 %v34_v28 }
  0x1f   :  { %382 = vmatpush3.msra.mxu0 %v34_v28 }
  0x20   :  { %383 = vmatprep.subr.mxu0 %v33_v29 }
  0x21   :  { %384 = vmatpush3.msra.mxu0 %v33_v29 }
  0x22   :  { %386 = vmatmul.mubr.f32.vlgmr.msra.gmra.mxu0 %v30_v30 }
  0x23   :  { %388 = vmatprep.mubr.f32.mxu0 %v31_v31 }
  0x26   :  { %389 = vmatmul.mubr.f32.gmra.mxu0 %v32_v32 }
  0x8d   :  { %v239_v33 = vpop.permute.xlu0 %238 }
  0x8f   :  { %v249_v58 = vpop.permute.xlu1 %248 }
  0x91   :  { %v244_v36 = vpop.permute.xlu0 %243 }
  0x93   :  { %v254_v63 = vpop.permute.xlu1 %253 }
  0xcf   :  { %v401_v34 = vpop.f32.mrf.mxu1 }
  0xd1   :  { %v213_v38 = vpop.f32.mrf.mxu1 }
  0xd3   :  { %v404_v57 = vpop.f32.mrf.mxu1 }
  0xd5   :  { %v223_v60 = vpop.f32.mrf.mxu1 }
  0xe2   :  { %v387_v35 = vpop.f32.mrf.mxu0 }
  0xe3   :  { %v219_v37 = vadd.f32 %v401_v34, %v387_v35 }
  0xe4   :  { %v115_v39 = vpop.f32.mrf.mxu0 }
  0xe5   :  { %v257_v40 = vadd.f32 %v244_v36, %v219_v37  ;;  %v214_v41 = vadd.f32 %v213_v38, %v115_v39 }
  0xe6   :  { %v390_v56 = vpop.f32.mrf.mxu0 }
  0xe7   :  { %v256_v42 = vadd.f32 %v239_v33, %v214_v41  ;;  %v262_v43 = vsel %vm260_vm1, %v257_v40, -inf  ;;  %v229_v62 = vadd.f32 %v404_v57, %v390_v56 }
  0xe8   :  { %v125_v59 = vpop.f32.mrf.mxu0 }
  0xe9   :  { %v261_v44 = vsel %vm260_vm1, %v256_v42, -inf  ;;  %v224_v61 = vadd.f32 %v223_v60, %v125_v59  ;;  %v259_v1 = vadd.f32 %v254_v63, %v229_v62 }
  0xea   :  { %v263_v45 = vmax.f32 %v261_v44, %v262_v43 }
  0xeb   :  { %v258_v0 = vadd.f32 %v249_v58, %v224_v61 }
  0xec   :  { %v264_v46 = vrot.slane %v263_v45, 4 }
  0xee   :  { %v265_v47 = vmax.f32 %v263_v45, %v264_v46 }
  0xf0   :  { %v266_v48 = vrot.slane %v265_v47, 2 }
  0xf2   :  { %v267_v49 = vmax.f32 %v265_v47, %v266_v48 }
  0xf4   :  { %v268_v50 = vrot.slane %v267_v49, 1 }
  0xf6   :  { %v269_v51 = vmax.f32 %v267_v49, %v268_v50 }
  0xf8   :  { %v270_v52 = vsub.f32 %v256_v42, %v269_v51  ;;  %v271_v53 = vsub.f32 %v257_v40, %v269_v51 }
  0xfa   :  { %v272_v54 = vmul.f32 1.442695, %v270_v52  ;;  %v274_v55 = vmul.f32 1.442695, %v271_v53 }
  0xfc   :  { %409 = vpow2.f32 %v272_v54 }
  0xfd   :  { %411 = vpow2.f32 %v274_v55 }
 0x109   :  { %v410_v2 = vpop.eup %409 }
 0x10a   :  { %v412_v3 = vpop.eup %411  ;;  %v276_v4 = vsel %vm260_vm1, %v410_v2, 0.0  ;;  %v285_v5 = vmul.f32 %v410_v2, %v258_v0 }
 0x10b   :  { %v277_v6 = vsel %vm260_vm1, %v412_v3, 0.0  ;;  %v286_v7 = vmul.f32 %v412_v3, %v259_v1 }
 0x10c   :  { %v278_v8 = vadd.f32 %v277_v6, %v276_v4  ;;  %v287_v9 = vsel %vm260_vm1, %v285_v5, 0.0 }
 0x10d   :  { %v288_v10 = vsel %vm260_vm1, %v286_v7, 0.0 }
 0x10e   :  { %v279_v11 = vrot.slane %v278_v8, 4  ;;  %v289_v12 = vadd.f32 %v288_v10, %v287_v9 }
 0x110   :  { %v280_v13 = vadd.f32 %v279_v11, %v278_v8  ;;  %v290_v15 = vrot.slane %v289_v12, 4 }
 0x112   :  { %v281_v14 = vrot.slane %v280_v13, 2  ;;  %v291_v18 = vadd.f32 %v290_v15, %v289_v12 }
 0x114   :  { %v282_v16 = vadd.f32 %v281_v14, %v280_v13  ;;  %v292_v20 = vrot.slane %v291_v18, 2 }
 0x116   :  { %v283_v17 = vrot.slane %v282_v16, 1  ;;  %v293_v21 = vadd.f32 %v292_v20, %v291_v18 }
 0x118   :  { %v284_v19 = vadd.f32 %v283_v17, %v282_v16  ;;  %v294_v22 = vrot.slane %v293_v21, 1 }
 0x11a   :  { %413 = vrcp.f32 %v284_v19  ;;  %v295_v23 = vadd.f32 %v294_v22, %v293_v21 }
 0x127   :  { %v414_v24 = vpop.eup %413 }
 0x128   :  { %v297_v25 = vmul.f32 %v414_v24, %v295_v23 }
 0x12a   :  { %v324_v26 = vmul.f32 -1.442695, %v297_v25 }
 0x12c   :  { %415 = vpow2.f32 %v324_v26 }
 0x139   :  { %v416_v27 = vpop.eup %415 }
 0x13a   :  { %v301_v28 = vadd.f32 1.0, %v416_v27 }
 0x13c   :  { %417 = vrcp.f32 %v301_v28 }
 0x149   :  { %v418_v29 = vpop.eup %417 }
 0x14a   :  { %305 = vst.msk [vmem:[#allocation2] sm:$0x1] %vm304_vm2, %v418_v29 }
 0x14b   :  { %430 = shalt.err (!%p427_p4)
}
 0x14c   :  { %315 = dma.vmem_to_hbm [thread:$0]  %s313_s3, 16, %s587_s5, [#allocation3]  }
 0x14d   :  { %439 = dma.done.wait [#allocation3], 16  }
 0x14e   :  { %440 = vsyncadd [#allocation3], 4294967280 }
 0x14f   :  { %319 = vsyncpa [#allocation3], 1 }

</bundles_post_ra>
